<compile_context>
chip_gen: v7x
topology: tpu7x:2x2x1
jax: 0.10.0
libtpu: 0.0.40
codegen_flags: <defaults>
</compile_context>

<pallas_src>
import numpy as np

import jax
import jax.numpy as jnp
from jax.experimental import pallas as pl
from jax.experimental.pallas import tpu as pltpu

# ---------------- configuration (small, consistent with the module) ----------------
BATCH = 2
SPATIAL = 8                # H = W = 8
OBS_CHANNELS = 4           # conv in_channels (in_channels - fc_input_dim)
FC_INPUT_DIM = 8           # latent_size
NUM_CONV_LAYERS = 2        # -> num_fc_encoder_layers = 2
NUM_HIDDEN_LAYERS = 2
NUM_FILTERS = 16
SIZE_HIDDEN_LAYERS = 32
KH = KW = 3
NEG_SLOPE = 0.01           # nn.LeakyReLU default

WC0 = SPATIAL * OBS_CHANNELS      # 32  : conv1 input row-slab lane width, lanes = (w, c)
WC1 = SPATIAL * NUM_FILTERS       # 128 : conv output row-slab lane width
HID = SIZE_HIDDEN_LAYERS
FLAT = NUM_FILTERS * SPATIAL * SPATIAL   # 1024 flattened conv features per example

# The fused kernel below is written for exactly this layer configuration.
assert NUM_CONV_LAYERS == 2 and NUM_HIDDEN_LAYERS == 2
assert WC1 == 128                 # conv row slabs are exactly lane-dense

# ---- packed-weight row offsets (static; shared by pack_params and the kernel) ----
# conv slab, lane width WC1 (=128):
R_T1 = 0                          # stacked conv1 Toeplitz   (KH*WC0 = 96 rows)
R_B1 = R_T1 + KH * WC0            # 96  conv1 bias row
R_B2 = R_B1 + 1                   # 97  conv2 bias row
R_T2 = R_B1 + 8                   # 104 stacked conv2 Toeplitz (KH*WC1 = 384 rows), 8-row aligned
CONV_ROWS = R_T2 + KH * WC1       # 488
# fc slab, lane width HID (=32):
R_WE1 = 0                         # fc_encoder[0] weight   (FC_INPUT_DIM rows)
R_WE2 = R_WE1 + FC_INPUT_DIM      # 8    fc_encoder[1] weight (HID rows)
R_WB0C = R_WE2 + HID              # 40   fc_backbone[0] conv part (FLAT rows, 128-row blocks per i)
R_WB0F = R_WB0C + FLAT            # 1064 fc_backbone[0] fc part (HID rows)
R_WB1 = R_WB0F + HID              # 1096 fc_backbone[1] weight (HID rows)
R_BE1 = R_WB1 + HID               # 1128 bias rows (be1, be2, bb0, bb1)
R_BE2 = R_BE1 + 1
R_BB0 = R_BE1 + 2
R_BB1 = R_BE1 + 3
FC_ROWS = R_BE1 + 8               # 1136


def _leaky(y):
    return jnp.where(y >= 0.0, y, NEG_SLOPE * y)


def _mm(a, b):
    # f32 MXU matmul, f32 accumulate (matches the f32 PyTorch module).
    return jnp.dot(a, b, preferred_element_type=jnp.float32)


def _stack_vertical_taps(v, batch):
    """v: (H*B, W*C) row slabs in (spatial-row, batch) order.  Returns (H*B, 3*W*C) with the
    (i-1, i, i+1) rows concatenated along lanes (zero rows at the H borders), so a 3x3 SAME
    conv layer becomes ONE matmul against the K-stacked width-Toeplitz weight."""
    bh, wc = v.shape
    zeros = jnp.zeros((batch, wc), v.dtype)
    prev = jnp.concatenate([zeros, v[: bh - batch]], axis=0)   # input row i-1 (zero for i == 0)
    nxt = jnp.concatenate([v[batch:], zeros], axis=0)          # input row i+1 (zero for i == H-1)
    return jnp.concatenate([prev, v, nxt], axis=1)


# ---------------- the single fused Pallas kernel (3 inputs, no scratch) ----------------
def _split_backbone_kernel(acts_ref, wconv_ref, wfc_ref, out_ref):
    batch = out_ref.shape[0]
    bh = acts_ref.shape[0]
    height = bh // batch

    acts = acts_ref[...]                           # one packed activation DMA
    x = acts[:, :WC0]                              # conv input row slabs, rows ordered (i, b)
    fc = acts[:batch, WC0:WC0 + FC_INPUT_DIM]      # latent slice, row b = batch b

    # ---- conv1: 3x3 SAME + LeakyReLU as one (BH, 3*WC0) @ (3*WC0, WC1) matmul ----
    y = _mm(_stack_vertical_taps(x, batch), wconv_ref[R_T1:R_T1 + KH * WC0, :])
    y = _leaky(y + wconv_ref[R_B1:R_B1 + 1, :])

    # ---- conv2: one (BH, 3*WC1) @ (3*WC1, WC1) matmul ----
    y = _mm(_stack_vertical_taps(y, batch), wconv_ref[R_T2:R_T2 + KH * WC1, :])
    y = _leaky(y + wconv_ref[R_B2:R_B2 + 1, :])    # encoded_obs row slabs (H*B, WC1)

    # ---- fc_encoder on the latent slice ----
    h = _leaky(_mm(fc, wfc_ref[R_WE1:R_WE1 + FC_INPUT_DIM, :]) + wfc_ref[R_BE1:R_BE1 + 1, :])
    h = _leaky(_mm(h, wfc_ref[R_WE2:R_WE2 + HID, :]) + wfc_ref[R_BE2:R_BE2 + 1, :])

    # ---- fc_backbone[0] without the concat: fc partial product + per-spatial-row conv blocks ----
    # (rows are (i, b)-ordered, so each slice is a contiguous, aligned (B, WC1) block)
    z = _mm(h, wfc_ref[R_WB0F:R_WB0F + HID, :]) + wfc_ref[R_BB0:R_BB0 + 1, :]
    for i in range(height):
        rows_i = y[i * batch:(i + 1) * batch, :]                       # (B, WC1)
        w_i = wfc_ref[R_WB0C + i * WC1:R_WB0C + (i + 1) * WC1, :]      # (WC1, HID), 8-row aligned
        z = z + _mm(rows_i, w_i)
    z = _leaky(z)

    # ---- fc_backbone[1] ----
    z = _leaky(_mm(z, wfc_ref[R_WB1:R_WB1 + HID, :]) + wfc_ref[R_BB1:R_BB1 + 1, :])
    out_ref[...] = z.astype(out_ref.dtype)


# ---------------- init-time weight preprocessing ----------------
def conv_weight_to_row_toeplitz(w_hwio, width):
    """(KH,KW,Cin,Cout) HWIO conv weight -> (KH, width*Cin, width*Cout) blocks implementing the
    width direction of a 3x3 SAME conv as one dense matmul per vertical tap."""
    w = np.asarray(w_hwio)
    kh, kw, cin, cout = w.shape
    t = np.zeros((kh, width * cin, width * cout), np.float32)
    for di in range(kh):
        for jo in range(width):
            for dj in range(kw):
                ji = jo + dj - 1
                if 0 <= ji < width:
                    t[di, ji * cin:(ji + 1) * cin, jo * cout:(jo + 1) * cout] = w[di, dj]
    return t


def init_params(key):
    """Synthetic parameters in torch layout (HWIO convs, (in,out) linears, torch-flatten rows)."""
    def dense(k, fan_in, fan_out):
        kw_, kb_ = jax.random.split(k)
        scale = 1.0 / jnp.sqrt(jnp.float32(fan_in))
        w = jax.random.normal(kw_, (fan_in, fan_out), jnp.float32) * scale
        b = jax.random.normal(kb_, (fan_out,), jnp.float32) * 0.01
        return w, b

    def conv(k, cin, cout):
        kw_, kb_ = jax.random.split(k)
        scale = 1.0 / jnp.sqrt(jnp.float32(cin * KH * KW))
        w = jax.random.normal(kw_, (KH, KW, cin, cout), jnp.float32) * scale
        b = jax.random.normal(kb_, (cout,), jnp.float32) * 0.01
        return w, b

    keys = jax.random.split(key, 16)
    params = {"conv": [], "fc_encoder": [], "fc_backbone": []}
    k = 0
    cin = OBS_CHANNELS
    for _ in range(NUM_CONV_LAYERS):
        params["conv"].append(conv(keys[k], cin, NUM_FILTERS)); k += 1
        cin = NUM_FILTERS
    fin = FC_INPUT_DIM
    for _ in range(NUM_CONV_LAYERS):                 # num_fc_encoder_layers == num_conv_layers
        params["fc_encoder"].append(dense(keys[k], fin, SIZE_HIDDEN_LAYERS)); k += 1
        fin = SIZE_HIDDEN_LAYERS
    fin = FLAT + SIZE_HIDDEN_LAYERS                  # replaced fc_backbone[0]
    for _ in range(NUM_HIDDEN_LAYERS):
        params["fc_backbone"].append(dense(keys[k], fin, SIZE_HIDDEN_LAYERS)); k += 1
        fin = SIZE_HIDDEN_LAYERS
    return params


def pack_params(params):
    """Torch-layout params -> two packed weight slabs (static row offsets, see R_* constants)."""
    (w1, b1), (w2, b2) = params["conv"]
    t1 = conv_weight_to_row_toeplitz(w1, SPATIAL)                       # (3, WC0, WC1)
    t2 = conv_weight_to_row_toeplitz(w2, SPATIAL)                       # (3, WC1, WC1)

    wconv = np.zeros((CONV_ROWS, WC1), np.float32)
    wconv[R_T1:R_T1 + KH * WC0] = t1.reshape(KH * WC0, WC1)             # K-stacked taps (prev,cur,next)
    wconv[R_B1] = np.tile(np.asarray(b1), SPATIAL)                      # bias broadcast over (j, c) lanes
    wconv[R_B2] = np.tile(np.asarray(b2), SPATIAL)
    wconv[R_T2:R_T2 + KH * WC1] = t2.reshape(KH * WC1, WC1)

    (we1, be1), (we2, be2) = params["fc_encoder"]
    (wb0, bb0), (wb1, bb1) = params["fc_backbone"]

    wb0_conv_torch = np.asarray(wb0[:FLAT])                             # rows in NCHW-flatten order
    wb0_fc = np.asarray(wb0[FLAT:])
    # permute conv rows to the kernel's (i, j, c) row-slab flatten order
    wb0_conv = np.transpose(
        wb0_conv_torch.reshape(NUM_FILTERS, SPATIAL, SPATIAL, HID),
        (1, 2, 0, 3),
    ).reshape(FLAT, HID)

    wfc = np.zeros((FC_ROWS, HID), np.float32)
    wfc[R_WE1:R_WE1 + FC_INPUT_DIM] = np.asarray(we1)
    wfc[R_WE2:R_WE2 + HID] = np.asarray(we2)
    wfc[R_WB0C:R_WB0C + FLAT] = wb0_conv
    wfc[R_WB0F:R_WB0F + HID] = wb0_fc
    wfc[R_WB1:R_WB1 + HID] = np.asarray(wb1)
    wfc[R_BE1] = np.asarray(be1)
    wfc[R_BE2] = np.asarray(be2)
    wfc[R_BB0] = np.asarray(bb0)
    wfc[R_BB1] = np.asarray(bb1)

    return dict(wconv=jnp.asarray(wconv), wfc=jnp.asarray(wfc))


# ---------------- SplitBackbone.forward (single fused pallas_call, 3 input DMAs) ----------------
@jax.jit
def split_backbone_forward(packed, obs_nchw):
    B = obs_nchw.shape[0]
    fc_in = obs_nchw[:, -FC_INPUT_DIM:, 0, 0]                           # (B, fc_input_dim)
    x = jnp.transpose(obs_nchw[:, :OBS_CHANNELS], (0, 2, 3, 1))         # NHWC, once on host
    x = jnp.transpose(x, (1, 0, 2, 3)).reshape(SPATIAL * B, WC0)        # rows (i, b), lanes (w, c)
    fc_rows = jnp.zeros((SPATIAL * B, FC_INPUT_DIM), jnp.float32).at[:B].set(fc_in)
    acts = jnp.concatenate([x, fc_rows], axis=1)                        # one packed activation slab

    # TODO(synk): for real batch sizes, add a grid over row blocks with
    # dimension_semantics=("parallel",) so weights stay VMEM-resident and both v7x TCs are used.
    return pl.pallas_call(
        _split_backbone_kernel,
        out_shape=jax.ShapeDtypeStruct((B, HID), jnp.float32),
        in_specs=[pl.BlockSpec(memory_space=pltpu.MemorySpace.VMEM)] * 3,
        out_specs=pl.BlockSpec(memory_space=pltpu.MemorySpace.VMEM),
    )(acts, packed["wconv"], packed["wfc"])


# ---------------- pure-JAX reference (torch layout / torch semantics) ----------------
def reference_forward(params, obs_nchw):
    hi = jax.lax.Precision.HIGHEST
    fc_in = obs_nchw[:, -FC_INPUT_DIM:, 0, 0]
    x = jnp.transpose(obs_nchw[:, :OBS_CHANNELS], (0, 2, 3, 1))
    for w, b in params["conv"]:
        x = jax.lax.conv_general_dilated(
            x, w, window_strides=(1, 1), padding="SAME",
            dimension_numbers=("NHWC", "HWIO", "NHWC"), precision=hi)
        x = _leaky(x + b)
    enc = jnp.transpose(x, (0, 3, 1, 2)).reshape(x.shape[0], -1)        # torch nn.Flatten (NCHW)
    h = fc_in
    for w, b in params["fc_encoder"]:
        h = _leaky(jnp.dot(h, w, precision=hi) + b)
    z = jnp.concatenate([enc, h], axis=1)
    for w, b in params["fc_backbone"]:
        z = _leaky(jnp.dot(z, w, precision=hi) + b)
    return z


if __name__ == "__main__":
    key = jax.random.PRNGKey(0)
    k_obs, k_params = jax.random.split(key)
    total_channels = OBS_CHANNELS + FC_INPUT_DIM        # latent channels appended like PyTorch
    obs = jax.random.normal(k_obs, (BATCH, total_channels, SPATIAL, SPATIAL), jnp.float32)

    params = init_params(k_params)
    packed = pack_params(params)

    out = split_backbone_forward(packed, obs)
    jax.block_until_ready(out)
    assert out.shape == (BATCH, SIZE_HIDDEN_LAYERS), out.shape
    assert bool(jnp.all(jnp.isfinite(out)))

    ref = reference_forward(params, obs)
    max_err = float(jnp.max(jnp.abs(out - ref)))
    assert max_err < 2e-2, f"max abs error vs pure-JAX reference: {max_err}"

    print("KERNEL_OK")
</pallas_src>

<mosaic_0001>
module attributes {stable_mosaic.version = 11 : i64} {
  func.func @_split_backbone_kernel(%arg0: memref<16x40xf32, #tpu.memory_space<vmem>>, %arg1: memref<488x128xf32, #tpu.memory_space<vmem>>, %arg2: memref<1136x32xf32, #tpu.memory_space<vmem>>, %arg3: memref<2x32xf32, #tpu.memory_space<vmem>>) attributes {dimension_semantics = [], scalar_prefetch = 0 : i64, scratch_operands = 0 : i64, tpu.core_type = #tpu.core_type<tc>} {
    %c0 = arith.constant 0 : index
    %c0_0 = arith.constant 0 : index
    %0 = vector.load %arg0[%c0, %c0_0] : memref<16x40xf32, #tpu.memory_space<vmem>>, vector<16x40xf32>
    %1 = vector.extract_strided_slice %0 {offsets = [0, 0], sizes = [16, 32], strides = [1, 1]} : vector<16x40xf32> to vector<16x32xf32>
    %2 = vector.extract_strided_slice %0 {offsets = [0, 32], sizes = [2, 8], strides = [1, 1]} : vector<16x40xf32> to vector<2x8xf32>
    %cst = arith.constant 0.000000e+00 : f32
    %3 = vector.broadcast %cst : f32 to vector<2x32xf32>
    %4 = vector.extract_strided_slice %1 {offsets = [0, 0], sizes = [14, 32], strides = [1, 1]} : vector<16x32xf32> to vector<14x32xf32>
    %5 = tpu.concatenate %3, %4 in 0 : vector<2x32xf32>, vector<14x32xf32> -> vector<16x32xf32>
    %6 = vector.extract_strided_slice %1 {offsets = [2, 0], sizes = [14, 32], strides = [1, 1]} : vector<16x32xf32> to vector<14x32xf32>
    %7 = tpu.concatenate %6, %3 in 0 : vector<14x32xf32>, vector<2x32xf32> -> vector<16x32xf32>
    %8 = tpu.concatenate %5, %1, %7 in 1 : vector<16x32xf32>, vector<16x32xf32>, vector<16x32xf32> -> vector<16x96xf32>
    %c0_1 = arith.constant 0 : index
    %c0_2 = arith.constant 0 : index
    %9 = vector.load %arg1[%c0_1, %c0_2] : memref<488x128xf32, #tpu.memory_space<vmem>>, vector<96x128xf32>
    %cst_3 = arith.constant dense<0.000000e+00> : vector<16x128xf32>
    %10 = tpu.matmul %8, %9, %cst_3 {dimension_numbers = #tpu.dot_dimension_numbers<[1], [0], [0], [1], [0, 0, 1, 1], [], []>} : vector<16x96xf32>, vector<96x128xf32>, vector<16x128xf32> -> vector<16x128xf32>
    %c96 = arith.constant 96 : index
    %c0_4 = arith.constant 0 : index
    %11 = vector.load %arg1[%c96, %c0_4] : memref<488x128xf32, #tpu.memory_space<vmem>>, vector<1x128xf32>
    %12 = vector.broadcast %11 : vector<1x128xf32> to vector<16x128xf32>
    %13 = arith.addf %10, %12 : vector<16x128xf32>
    %cst_5 = arith.constant 0.000000e+00 : f32
    %14 = vector.broadcast %cst_5 : f32 to vector<16x128xf32>
    %15 = arith.cmpf oge, %13, %14 : vector<16x128xf32>
    %cst_6 = arith.constant 0.00999999977 : f32
    %16 = vector.broadcast %cst_6 : f32 to vector<16x128xf32>
    %17 = arith.mulf %16, %13 : vector<16x128xf32>
    %18 = arith.select %15, %13, %17 : vector<16x128xi1>, vector<16x128xf32>
    %cst_7 = arith.constant 0.000000e+00 : f32
    %19 = vector.broadcast %cst_7 : f32 to vector<2x128xf32>
    %20 = vector.extract_strided_slice %18 {offsets = [0, 0], sizes = [14, 128], strides = [1, 1]} : vector<16x128xf32> to vector<14x128xf32>
    %21 = tpu.concatenate %19, %20 in 0 : vector<2x128xf32>, vector<14x128xf32> -> vector<16x128xf32>
    %22 = vector.extract_strided_slice %18 {offsets = [2, 0], sizes = [14, 128], strides = [1, 1]} : vector<16x128xf32> to vector<14x128xf32>
    %23 = tpu.concatenate %22, %19 in 0 : vector<14x128xf32>, vector<2x128xf32> -> vector<16x128xf32>
    %24 = tpu.concatenate %21, %18, %23 in 1 : vector<16x128xf32>, vector<16x128xf32>, vector<16x128xf32> -> vector<16x384xf32>
    %c104 = arith.constant 104 : index
    %c0_8 = arith.constant 0 : index
    %25 = vector.load %arg1[%c104, %c0_8] : memref<488x128xf32, #tpu.memory_space<vmem>>, vector<384x128xf32>
    %cst_9 = arith.constant dense<0.000000e+00> : vector<16x128xf32>
    %26 = tpu.matmul %24, %25, %cst_9 {dimension_numbers = #tpu.dot_dimension_numbers<[1], [0], [0], [1], [0, 0, 1, 1], [], []>} : vector<16x384xf32>, vector<384x128xf32>, vector<16x128xf32> -> vector<16x128xf32>
    %c97 = arith.constant 97 : index
    %c0_10 = arith.constant 0 : index
    %27 = vector.load %arg1[%c97, %c0_10] : memref<488x128xf32, #tpu.memory_space<vmem>>, vector<1x128xf32>
    %28 = vector.broadcast %27 : vector<1x128xf32> to vector<16x128xf32>
    %29 = arith.addf %26, %28 : vector<16x128xf32>
    %cst_11 = arith.constant 0.000000e+00 : f32
    %30 = vector.broadcast %cst_11 : f32 to vector<16x128xf32>
    %31 = arith.cmpf oge, %29, %30 : vector<16x128xf32>
    %cst_12 = arith.constant 0.00999999977 : f32
    %32 = vector.broadcast %cst_12 : f32 to vector<16x128xf32>
    %33 = arith.mulf %32, %29 : vector<16x128xf32>
    %34 = arith.select %31, %29, %33 : vector<16x128xi1>, vector<16x128xf32>
    %c0_13 = arith.constant 0 : index
    %c0_14 = arith.constant 0 : index
    %35 = vector.load %arg2[%c0_13, %c0_14] : memref<1136x32xf32, #tpu.memory_space<vmem>>, vector<8x32xf32>
    %cst_15 = arith.constant dense<0.000000e+00> : vector<2x32xf32>
    %36 = tpu.matmul %2, %35, %cst_15 {dimension_numbers = #tpu.dot_dimension_numbers<[1], [0], [0], [1], [0, 0, 1, 1], [], []>} : vector<2x8xf32>, vector<8x32xf32>, vector<2x32xf32> -> vector<2x32xf32>
    %c1128 = arith.constant 1128 : index
    %c0_16 = arith.constant 0 : index
    %37 = vector.load %arg2[%c1128, %c0_16] : memref<1136x32xf32, #tpu.memory_space<vmem>>, vector<1x32xf32>
    %38 = vector.broadcast %37 : vector<1x32xf32> to vector<2x32xf32>
    %39 = arith.addf %36, %38 : vector<2x32xf32>
    %cst_17 = arith.constant 0.000000e+00 : f32
    %40 = vector.broadcast %cst_17 : f32 to vector<2x32xf32>
    %41 = arith.cmpf oge, %39, %40 : vector<2x32xf32>
    %cst_18 = arith.constant 0.00999999977 : f32
    %42 = vector.broadcast %cst_18 : f32 to vector<2x32xf32>
    %43 = arith.mulf %42, %39 : vector<2x32xf32>
    %44 = arith.select %41, %39, %43 : vector<2x32xi1>, vector<2x32xf32>
    %c8 = arith.constant 8 : index
    %c0_19 = arith.constant 0 : index
    %45 = vector.load %arg2[%c8, %c0_19] : memref<1136x32xf32, #tpu.memory_space<vmem>>, vector<32x32xf32>
    %cst_20 = arith.constant dense<0.000000e+00> : vector<2x32xf32>
    %46 = tpu.matmul %44, %45, %cst_20 {dimension_numbers = #tpu.dot_dimension_numbers<[1], [0], [0], [1], [0, 0, 1, 1], [], []>} : vector<2x32xf32>, vector<32x32xf32>, vector<2x32xf32> -> vector<2x32xf32>
    %c1129 = arith.constant 1129 : index
    %c0_21 = arith.constant 0 : index
    %47 = vector.load %arg2[%c1129, %c0_21] : memref<1136x32xf32, #tpu.memory_space<vmem>>, vector<1x32xf32>
    %48 = vector.broadcast %47 : vector<1x32xf32> to vector<2x32xf32>
    %49 = arith.addf %46, %48 : vector<2x32xf32>
    %cst_22 = arith.constant 0.000000e+00 : f32
    %50 = vector.broadcast %cst_22 : f32 to vector<2x32xf32>
    %51 = arith.cmpf oge, %49, %50 : vector<2x32xf32>
    %cst_23 = arith.constant 0.00999999977 : f32
    %52 = vector.broadcast %cst_23 : f32 to vector<2x32xf32>
    %53 = arith.mulf %52, %49 : vector<2x32xf32>
    %54 = arith.select %51, %49, %53 : vector<2x32xi1>, vector<2x32xf32>
    %c1064 = arith.constant 1064 : index
    %c0_24 = arith.constant 0 : index
    %55 = vector.load %arg2[%c1064, %c0_24] : memref<1136x32xf32, #tpu.memory_space<vmem>>, vector<32x32xf32>
    %cst_25 = arith.constant dense<0.000000e+00> : vector<2x32xf32>
    %56 = tpu.matmul %54, %55, %cst_25 {dimension_numbers = #tpu.dot_dimension_numbers<[1], [0], [0], [1], [0, 0, 1, 1], [], []>} : vector<2x32xf32>, vector<32x32xf32>, vector<2x32xf32> -> vector<2x32xf32>
    %c1130 = arith.constant 1130 : index
    %c0_26 = arith.constant 0 : index
    %57 = vector.load %arg2[%c1130, %c0_26] : memref<1136x32xf32, #tpu.memory_space<vmem>>, vector<1x32xf32>
    %58 = vector.broadcast %57 : vector<1x32xf32> to vector<2x32xf32>
    %59 = arith.addf %56, %58 : vector<2x32xf32>
    %60 = vector.extract_strided_slice %34 {offsets = [0, 0], sizes = [2, 128], strides = [1, 1]} : vector<16x128xf32> to vector<2x128xf32>
    %c40 = arith.constant 40 : index
    %c0_27 = arith.constant 0 : index
    %61 = vector.load %arg2[%c40, %c0_27] : memref<1136x32xf32, #tpu.memory_space<vmem>>, vector<128x32xf32>
    %cst_28 = arith.constant dense<0.000000e+00> : vector<2x32xf32>
    %62 = tpu.matmul %60, %61, %cst_28 {dimension_numbers = #tpu.dot_dimension_numbers<[1], [0], [0], [1], [0, 0, 1, 1], [], []>} : vector<2x128xf32>, vector<128x32xf32>, vector<2x32xf32> -> vector<2x32xf32>
    %63 = arith.addf %59, %62 : vector<2x32xf32>
    %64 = vector.extract_strided_slice %34 {offsets = [2, 0], sizes = [2, 128], strides = [1, 1]} : vector<16x128xf32> to vector<2x128xf32>
    %c168 = arith.constant 168 : index
    %c0_29 = arith.constant 0 : index
    %65 = vector.load %arg2[%c168, %c0_29] : memref<1136x32xf32, #tpu.memory_space<vmem>>, vector<128x32xf32>
    %cst_30 = arith.constant dense<0.000000e+00> : vector<2x32xf32>
    %66 = tpu.matmul %64, %65, %cst_30 {dimension_numbers = #tpu.dot_dimension_numbers<[1], [0], [0], [1], [0, 0, 1, 1], [], []>} : vector<2x128xf32>, vector<128x32xf32>, vector<2x32xf32> -> vector<2x32xf32>
    %67 = arith.addf %63, %66 : vector<2x32xf32>
    %68 = vector.extract_strided_slice %34 {offsets = [4, 0], sizes = [2, 128], strides = [1, 1]} : vector<16x128xf32> to vector<2x128xf32>
    %c296 = arith.constant 296 : index
    %c0_31 = arith.constant 0 : index
    %69 = vector.load %arg2[%c296, %c0_31] : memref<1136x32xf32, #tpu.memory_space<vmem>>, vector<128x32xf32>
    %cst_32 = arith.constant dense<0.000000e+00> : vector<2x32xf32>
    %70 = tpu.matmul %68, %69, %cst_32 {dimension_numbers = #tpu.dot_dimension_numbers<[1], [0], [0], [1], [0, 0, 1, 1], [], []>} : vector<2x128xf32>, vector<128x32xf32>, vector<2x32xf32> -> vector<2x32xf32>
    %71 = arith.addf %67, %70 : vector<2x32xf32>
    %72 = vector.extract_strided_slice %34 {offsets = [6, 0], sizes = [2, 128], strides = [1, 1]} : vector<16x128xf32> to vector<2x128xf32>
    %c424 = arith.constant 424 : index
    %c0_33 = arith.constant 0 : index
    %73 = vector.load %arg2[%c424, %c0_33] : memref<1136x32xf32, #tpu.memory_space<vmem>>, vector<128x32xf32>
    %cst_34 = arith.constant dense<0.000000e+00> : vector<2x32xf32>
    %74 = tpu.matmul %72, %73, %cst_34 {dimension_numbers = #tpu.dot_dimension_numbers<[1], [0], [0], [1], [0, 0, 1, 1], [], []>} : vector<2x128xf32>, vector<128x32xf32>, vector<2x32xf32> -> vector<2x32xf32>
    %75 = arith.addf %71, %74 : vector<2x32xf32>
    %76 = vector.extract_strided_slice %34 {offsets = [8, 0], sizes = [2, 128], strides = [1, 1]} : vector<16x128xf32> to vector<2x128xf32>
    %c552 = arith.constant 552 : index
    %c0_35 = arith.constant 0 : index
    %77 = vector.load %arg2[%c552, %c0_35] : memref<1136x32xf32, #tpu.memory_space<vmem>>, vector<128x32xf32>
    %cst_36 = arith.constant dense<0.000000e+00> : vector<2x32xf32>
    %78 = tpu.matmul %76, %77, %cst_36 {dimension_numbers = #tpu.dot_dimension_numbers<[1], [0], [0], [1], [0, 0, 1, 1], [], []>} : vector<2x128xf32>, vector<128x32xf32>, vector<2x32xf32> -> vector<2x32xf32>
    %79 = arith.addf %75, %78 : vector<2x32xf32>
    %80 = vector.extract_strided_slice %34 {offsets = [10, 0], sizes = [2, 128], strides = [1, 1]} : vector<16x128xf32> to vector<2x128xf32>
    %c680 = arith.constant 680 : index
    %c0_37 = arith.constant 0 : index
    %81 = vector.load %arg2[%c680, %c0_37] : memref<1136x32xf32, #tpu.memory_space<vmem>>, vector<128x32xf32>
    %cst_38 = arith.constant dense<0.000000e+00> : vector<2x32xf32>
    %82 = tpu.matmul %80, %81, %cst_38 {dimension_numbers = #tpu.dot_dimension_numbers<[1], [0], [0], [1], [0, 0, 1, 1], [], []>} : vector<2x128xf32>, vector<128x32xf32>, vector<2x32xf32> -> vector<2x32xf32>
    %83 = arith.addf %79, %82 : vector<2x32xf32>
    %84 = vector.extract_strided_slice %34 {offsets = [12, 0], sizes = [2, 128], strides = [1, 1]} : vector<16x128xf32> to vector<2x128xf32>
    %c808 = arith.constant 808 : index
    %c0_39 = arith.constant 0 : index
    %85 = vector.load %arg2[%c808, %c0_39] : memref<1136x32xf32, #tpu.memory_space<vmem>>, vector<128x32xf32>
    %cst_40 = arith.constant dense<0.000000e+00> : vector<2x32xf32>
    %86 = tpu.matmul %84, %85, %cst_40 {dimension_numbers = #tpu.dot_dimension_numbers<[1], [0], [0], [1], [0, 0, 1, 1], [], []>} : vector<2x128xf32>, vector<128x32xf32>, vector<2x32xf32> -> vector<2x32xf32>
    %87 = arith.addf %83, %86 : vector<2x32xf32>
    %88 = vector.extract_strided_slice %34 {offsets = [14, 0], sizes = [2, 128], strides = [1, 1]} : vector<16x128xf32> to vector<2x128xf32>
    %c936 = arith.constant 936 : index
    %c0_41 = arith.constant 0 : index
    %89 = vector.load %arg2[%c936, %c0_41] : memref<1136x32xf32, #tpu.memory_space<vmem>>, vector<128x32xf32>
    %cst_42 = arith.constant dense<0.000000e+00> : vector<2x32xf32>
    %90 = tpu.matmul %88, %89, %cst_42 {dimension_numbers = #tpu.dot_dimension_numbers<[1], [0], [0], [1], [0, 0, 1, 1], [], []>} : vector<2x128xf32>, vector<128x32xf32>, vector<2x32xf32> -> vector<2x32xf32>
    %91 = arith.addf %87, %90 : vector<2x32xf32>
    %cst_43 = arith.constant 0.000000e+00 : f32
    %92 = vector.broadcast %cst_43 : f32 to vector<2x32xf32>
    %93 = arith.cmpf oge, %91, %92 : vector<2x32xf32>
    %cst_44 = arith.constant 0.00999999977 : f32
    %94 = vector.broadcast %cst_44 : f32 to vector<2x32xf32>
    %95 = arith.mulf %94, %91 : vector<2x32xf32>
    %96 = arith.select %93, %91, %95 : vector<2x32xi1>, vector<2x32xf32>
    %c1096 = arith.constant 1096 : index
    %c0_45 = arith.constant 0 : index
    %97 = vector.load %arg2[%c1096, %c0_45] : memref<1136x32xf32, #tpu.memory_space<vmem>>, vector<32x32xf32>
    %cst_46 = arith.constant dense<0.000000e+00> : vector<2x32xf32>
    %98 = tpu.matmul %96, %97, %cst_46 {dimension_numbers = #tpu.dot_dimension_numbers<[1], [0], [0], [1], [0, 0, 1, 1], [], []>} : vector<2x32xf32>, vector<32x32xf32>, vector<2x32xf32> -> vector<2x32xf32>
    %c1131 = arith.constant 1131 : index
    %c0_47 = arith.constant 0 : index
    %99 = vector.load %arg2[%c1131, %c0_47] : memref<1136x32xf32, #tpu.memory_space<vmem>>, vector<1x32xf32>
    %100 = vector.broadcast %99 : vector<1x32xf32> to vector<2x32xf32>
    %101 = arith.addf %98, %100 : vector<2x32xf32>
    %cst_48 = arith.constant 0.000000e+00 : f32
    %102 = vector.broadcast %cst_48 : f32 to vector<2x32xf32>
    %103 = arith.cmpf oge, %101, %102 : vector<2x32xf32>
    %cst_49 = arith.constant 0.00999999977 : f32
    %104 = vector.broadcast %cst_49 : f32 to vector<2x32xf32>
    %105 = arith.mulf %104, %101 : vector<2x32xf32>
    %106 = arith.select %103, %101, %105 : vector<2x32xi1>, vector<2x32xf32>
    %c0_50 = arith.constant 0 : index
    %c0_51 = arith.constant 0 : index
    %107 = vector.load %arg3[%c0_50, %c0_51] : memref<2x32xf32, #tpu.memory_space<vmem>>, vector<2x32xf32>
    tpu.vector_store %arg3[%c0_50, %c0_51], %106 {strides = array<i32>} : memref<2x32xf32, #tpu.memory_space<vmem>>, vector<2x32xf32>,
    return
  }
}

</mosaic_0001>

<bundles_post_ra>
// kernel: split_backbone_forward.1
= control target key start
LH: loop header
LB: loop body
LE: loop exit
PB: predicated region body
PF: predicated region fallthrough
CT: control target
= control target key end

     0   :  { %vm26_vm0 = vcmask 1045504   ;;  %s2406_s18 = smov 32   ;;  %s2407_s28 = smov 64   ;;  %vm19_vm1 = vcmask 1041408   ;;  %v2408_v19 = vmov 0.0   ;;  %vm2409_vm2 = vmmov 0   ;;  %s3207_s0 = inlined_call_operand.vmem [shape: f32[16,40], index: 0, kind: input, shape index: {}]   ;;  %s3208_s1 = inlined_call_operand.vmem [shape: f32[488,128], index: 1, kind: input, shape index: {}]   ;;  %s3209_s2 = inlined_call_operand.vmem [shape: f32[1136,32], index: 2, kind: input, shape index: {}]   ;;  %s3210_s3 = inlined_call_operand.hbm [shape: f32[2,32], index: 3, kind: output, shape index: {}]  }
   0x1   :  { %v2436_v0 = vld [vmem:[%s3207_s0] sm:$0xff]  ;;  %v16_v1 = vld [vmem:[%s3207_s0 + $0x8] sm:$0xff]  ;;  %v53_v6 = vld [vmem:[%s3208_s1 + $0x10] sm:$0xff]  ;;  %1744 = vmatprep.subr.mxu1 %v2408_v19  ;;  %1746 = vmatprep.mubr.msk.f32.mxu1 %vm2409_vm2, %v2408_v19  ;;  %s2410_s8 = smov 96  }
   0x2   :  { %v51_v2 = vld [vmem:[%s3208_s1] sm:$0xff]  ;;  %32 = vrot.lane.b32.xlu0 %v2436_v0, %s2406_s18  ;;  %v27_v3 = vrot.slane %v2436_v0, 2  ;;  %v28_v4 = vrot.slane %v16_v1, 2  ;;  %v52_v5 = vld [vmem:[%s3208_s1 + $0x8] sm:$0xff]  ;;  %v54_v7 = vld [vmem:[%s3208_s1 + $0x18] sm:$0xff]  ;;  %v20_v13 = vrot.slane %v2436_v0, 6 }
   0x3   :  { %v2062_v8 = vpack.c.bf16 %v52_v5, %v51_v2  ;;  %v2066_v9 = vpack.c.bf16 %v54_v7, %v53_v6  ;;  %v55_v11 = vld [vmem:[%s3208_s1 + $0x20] sm:$0xff]  ;;  %v56_v12 = vld [vmem:[%s3208_s1 + $0x28] sm:$0xff]  ;;  %v21_v14 = vrot.slane %v16_v1, 6  ;;  %v57_v20 = vld [vmem:[%s3208_s1 + $0x30] sm:$0xff] }
   0x4   :  { %v29_v10 = vsel %vm26_vm0, %v27_v3, %v28_v4  ;;  %v379_v15 = vld [vmem:[%s3209_s2] sm:$0xff]  ;;  %v31_v16 = vsel %vm26_vm0, %v28_v4, 0.0  ;;  %v2070_v17 = vpack.c.bf16 %v56_v12, %v55_v11  ;;  %v58_v21 = vld [vmem:[%s3208_s1 + $0x38] sm:$0xff]  ;;  %v60_v24 = vld [vmem:[%s3208_s1 + $0x48] sm:$0xff] }
   0x5   :  { %39 = vrot.lane.b32.xlu1 %v29_v10, %s2407_s28  ;;  %2063 = vmatprep.subr.bf16.mxu0 %v2062_v8  ;;  %v22_v18 = vsel %vm19_vm1, %v20_v13, %v21_v14  ;;  %v2074_v22 = vpack.c.bf16 %v58_v21, %v57_v20  ;;  %v59_v23 = vld [vmem:[%s3208_s1 + $0x40] sm:$0xff] }
   0x6   :  { %34 = vrot.lane.b32.xlu0 %v16_v1, %s2406_s18  ;;  %2065 = vmatpush3.bf16.msra.mxu0 %v2062_v8 }
   0x7   :  { %2067 = vmatprep.subr.bf16.mxu0 %v2066_v9  ;;  %1745 = vmatpush3.msra.mxu1 %v379_v15 }
   0x9   :  { %41 = vrot.lane.b32.xlu1 %v31_v16, %s2407_s28 }
   0xa   :  { %385 = vrot.lane.b32.xlu0 %v2436_v0, %s2410_s8  ;;  %2069 = vmatpush3.bf16.msra.mxu0 %v2066_v9 }
   0xb   :  { %2071 = vmatprep.subr.bf16.mxu0 %v2070_v17 }
   0xc   :  { %8 = vsyncpa [#allocation3], 0  ;;  %v2078_v25 = vpack.c.bf16 %v60_v24, %v59_v23  ;;  %v61_v26 = vld [vmem:[%s3208_s1 + $0x50] sm:$0xff]  ;;  %v62_v27 = vld [vmem:[%s3208_s1 + $0x58] sm:$0xff]  ;;  %v2411_v29 = vmov 0.0|0.0   ;;  %vm45_vm3 = vcmask 261120  }
   0xd   :  { %v2082_v28 = vpack.c.bf16 %v62_v27, %v61_v26  ;;  %2150 = vmatprep.subr.bf16.mxu1 %v2411_v29  ;;  %v186_v30 = vld [vmem:[%s3208_s1 + $0xe8] sm:$0xff]  ;;  %v187_v31 = vld [vmem:[%s3208_s1 + $0xf0] sm:$0xff]  ;;  %v25_v33 = vsel %vm19_vm1, 0.0, %v20_v13  ;;  %vm48_vm4 = vcmask 523264   ;;  %vm68_vm5 = vcmask 785408   ;;  %v188_v43 = vld [vmem:[%s3208_s1 + $0xf8] sm:$0xff] }
   0xe   :  { %2073 = vmatpush3.bf16.msra.mxu0 %v2070_v17  ;;  %v2086_v32 = vpack.c.bf16 %v187_v31, %v186_v30  ;;  %v170_v36 = vld [vmem:[%s3208_s1 + $0x68] sm:$0xff]  ;;  %v171_v38 = vld [vmem:[%s3208_s1 + $0x70] sm:$0xff]  ;;  %v189_v44 = vld [vmem:[%s3208_s1 + $0x100] sm:$0xff]  ;;  %vm387_vm6 = vcmask 64512   ;;  %s2412_s6 = smov [#allocation2]  }
   0xf   :  { %2075 = vmatprep.subr.bf16.mxu0 %v2074_v22  ;;  %v463_v39 = vld [vmem:[%s3209_s2 + $0x8] sm:$0xff]  ;;  %v464_v40 = vld [vmem:[%s3209_s2 + $0x10] sm:$0xff]  ;;  %v2088_v46 = vpack.c.bf16 %v171_v38, %v170_v36  ;;  %v2090_v49 = vpack.c.bf16 %v189_v44, %v188_v43  ;;  %v172_v50 = vld [vmem:[%s3208_s1 + $0x78] sm:$0xff]  ;;  %s1436_s7 = sshll.u32 %s2412_s6, 4  ;;  %s1437_s7 = int_to_ptr.vmem [resolvable:$true] %s1436_s7 }
  0x10   :  { %v2151_v47 = vpack.c.bf16 %v464_v40, %v463_v39  ;;  %v173_v51 = vld [vmem:[%s3208_s1 + $0x80] sm:$0xff]  ;;  %v190_v54 = vld [vmem:[%s3208_s1 + $0x108] sm:$0xff]  ;;  %v191_v55 = vld [vmem:[%s3208_s1 + $0x110] sm:$0xff]  ;;  %s2382_s8 = scalar_lea.vmem %s1437_s7, 32  ;;  %p2387_p1 = scmp.lt.s32.totalorder %s1437_s7, %s1437_s7 }
  0x11   :  { %v2092_v56 = vpack.c.bf16 %v173_v51, %v172_v50  ;;  %v2094_v57 = vpack.c.bf16 %v191_v55, %v190_v54  ;;  %v174_v58 = vld [vmem:[%s3208_s1 + $0x88] sm:$0xff]  ;;  %v175_v59 = vld [vmem:[%s3208_s1 + $0x90] sm:$0xff]  ;;  %v192_v60 = vld [vmem:[%s3208_s1 + $0x118] sm:$0xff]  ;;  %p2383_p0 = scmp.ne.s32.totalorder %s1437_s7, %s2382_s8  ;;  %p2388_p2 = scmp.lt.s32.totalorder %s2382_s8, %s2382_s8 }
  0x12   :  { %2077 = vmatpush3.bf16.msra.mxu0 %v2074_v22  ;;  %v193_v61 = vld [vmem:[%s3208_s1 + $0x120] sm:$0xff]  ;;  %v2096_v62 = vpack.c.bf16 %v175_v59, %v174_v58  ;;  %v176_v0 = vld [vmem:[%s3208_s1 + $0x98] sm:$0xff]  ;;  %v194_v2 = vld [vmem:[%s3208_s1 + $0x128] sm:$0xff] }
  0x13   :  { %2079 = vmatprep.subr.bf16.mxu0 %v2078_v25  ;;  %v2098_v63 = vpack.c.bf16 %v193_v61, %v192_v60  ;;  %v177_v1 = vld [vmem:[%s3208_s1 + $0xa0] sm:$0xff]  ;;  %v195_v3 = vld [vmem:[%s3208_s1 + $0x130] sm:$0xff]  ;;  %v178_v6 = vld [vmem:[%s3208_s1 + $0xa8] sm:$0xff]  ;;  %p2389_p3 = por %p2388_p2, %p2387_p1 }
  0x14   :  { %v2100_v4 = vpack.c.bf16 %v177_v1, %v176_v0  ;;  %v2102_v5 = vpack.c.bf16 %v195_v3, %v194_v2  ;;  %v179_v7 = vld [vmem:[%s3208_s1 + $0xb0] sm:$0xff]  ;;  %v196_v8 = vld [vmem:[%s3208_s1 + $0x138] sm:$0xff]  ;;  %v197_v9 = vld [vmem:[%s3208_s1 + $0x140] sm:$0xff] }
  0x15   :  { %v2104_v10 = vpack.c.bf16 %v179_v7, %v178_v6  ;;  %v2106_v11 = vpack.c.bf16 %v197_v9, %v196_v8  ;;  %v180_v12 = vld [vmem:[%s3208_s1 + $0xb8] sm:$0xff]  ;;  %v181_v13 = vld [vmem:[%s3208_s1 + $0xc0] sm:$0xff]  ;;  %v198_v15 = vld [vmem:[%s3208_s1 + $0x148] sm:$0xff]  ;;  %p2390_p4 = pnand %p2389_p3, %p2383_p0 }
  0x16   :  { %2081 = vmatpush3.bf16.msra.mxu0 %v2078_v25  ;;  %v2108_v14 = vpack.c.bf16 %v181_v13, %v180_v12  ;;  %v199_v16 = vld [vmem:[%s3208_s1 + $0x150] sm:$0xff]  ;;  %v465_v22 = vld [vmem:[%s3209_s2 + $0x18] sm:$0xff]  ;;  %v466_v23 = vld [vmem:[%s3209_s2 + $0x20] sm:$0xff] }
  0x17   :  { %2083 = vmatprep.subr.bf16.mxu0 %v2082_v28  ;;  %v2110_v17 = vpack.c.bf16 %v199_v16, %v198_v15  ;;  %v183_v20 = vld [vmem:[%s3208_s1 + $0xd0] sm:$0xff]  ;;  %v200_v24 = vld [vmem:[%s3208_s1 + $0x158] sm:$0xff]  ;;  %v201_v25 = vld [vmem:[%s3208_s1 + $0x160] sm:$0xff]  ;;  %v2154_v26 = vpack.c.bf16 %v466_v23, %v465_v22 }
  0x18   :  { %v2114_v27 = vpack.c.bf16 %v201_v25, %v200_v24  ;;  %v185_v30 = vld [vmem:[%s3208_s1 + $0xe0] sm:$0xff]  ;;  %v1451_v36 = vld [vmem:[%s3209_s2 + $0x468] ss:$0 sm:$0xff]  ;;  %v549_v38 = vld [vmem:[%s3209_s2 + $0x430] sm:$0xff] }
  0x19   :  { %v204_v50 = vld [vmem:[%s3208_s1 + $0x178] sm:$0xff]  ;;  %v205_v51 = vld [vmem:[%s3208_s1 + $0x180] sm:$0xff]  ;;  %vm1448_vm10 = vmneg %vm19_vm1 }
  0x1a   :  { %2085 = vmatpush3.bf16.msra.mxu0 %v2082_v28  ;;  %v184_v28 = vld [vmem:[%s3208_s1 + $0xd8] sm:$0xff]  ;;  %v2122_v59 = vpack.c.bf16 %v205_v51, %v204_v50  ;;  %v206_v60 = vld [vmem:[%s3208_s1 + $0x188] sm:$0xff]  ;;  %v207_v61 = vld [vmem:[%s3208_s1 + $0x190] sm:$0xff] }
  0x1b   :  { %2087 = vmatprep.subr.bf16.mxu0 %v2086_v32  ;;  %v2116_v31 = vpack.c.bf16 %v185_v30, %v184_v28  ;;  %v202_v32 = vld [vmem:[%s3208_s1 + $0x168] sm:$0xff]  ;;  %v2126_v0 = vpack.c.bf16 %v207_v61, %v206_v60  ;;  %v208_v1 = vld [vmem:[%s3208_s1 + $0x198] sm:$0xff]  ;;  %v209_v2 = vld [vmem:[%s3208_s1 + $0x1a0] sm:$0xff] }
  0x1c   :  { %v2130_v3 = vpack.c.bf16 %v209_v2, %v208_v1  ;;  %v212_v7 = vld [vmem:[%s3208_s1 + $0x1b8] sm:$0xff]  ;;  %v213_v8 = vld [vmem:[%s3208_s1 + $0x1c0] sm:$0xff] }
  0x1d   :  { %v2138_v9 = vpack.c.bf16 %v213_v8, %v212_v7  ;;  %v216_v13 = vld [vmem:[%s3208_s1 + $0x1d8] sm:$0xff]  ;;  %v633_v24 = vld [vmem:[%s3209_s2 + $0x40] sm:$0xff] }
  0x1e   :  { %v550_v16 = vld [vmem:[%s3209_s2 + $0x438] sm:$0xff] }
  0x1f   :  { %v632_v23 = vld [vmem:[%s3209_s2 + $0x38] sm:$0xff] }
  0x20   :  { %v2166_v25 = vpack.c.bf16 %v633_v24, %v632_v23  ;;  %v636_v30 = vld [vmem:[%s3209_s2 + $0x58] sm:$0xff]  ;;  %v717_v24 = vld [vmem:[%s3209_s2 + $0xa8] sm:$0xff] }
  0x21   :  { %v902_v2 = vld [vmem:[%s3209_s2 + $0x1d8] sm:$0xff] }
  0x22   :  { %v906_v8 = vld [vmem:[%s3209_s2 + $0x1f8] sm:$0xff] }
  0x74   :  { %v33_v34 = vpop.permute.xlu0 %32 }
  0x75   :  { %v46_v35 = vsel %vm45_vm3, %v25_v33, %v33_v34  ;;  %v203_v33 = vld [vmem:[%s3208_s1 + $0x170] sm:$0xff] }
  0x76   :  { %v2118_v34 = vpack.c.bf16 %v203_v33, %v202_v32  ;;  %v638_v33 = vld [vmem:[%s3209_s2 + $0x68] sm:$0xff] }
  0x77   :  { %v40_v37 = vpop.permute.xlu1 %39 }
  0x78   :  { %v35_v41 = vpop.permute.xlu0 %34  ;;  %v49_v42 = vsel %vm48_vm4, %v46_v35, %v40_v37  ;;  %v1444_v35 = vld [vmem:[%s3208_s1 + $0x60] ss:$0 sm:$0xff]  ;;  %v548_v37 = vld [vmem:[%s3209_s2 + $0x428] sm:$0xff] }
  0x79   :  { %v47_v45 = vsel %vm45_vm3, %v22_v18, %v35_v41  ;;  %1706 = vmatprep.mubr.msk.f32.mxu0 %vm68_vm5, %v49_v42  ;;  %v182_v18 = vld [vmem:[%s3208_s1 + $0xc8] sm:$0xff] }
  0x7a   :  { %v2112_v21 = vpack.c.bf16 %v183_v20, %v182_v18  ;;  %v630_v20 = vld [vmem:[%s3209_s2 + $0x28] sm:$0xff] }
  0x7b   :  { %v42_v48 = vpop.permute.xlu1 %41 }
  0x7c   :  { %v50_v52 = vsel %vm48_vm4, %v47_v45, %v42_v48  ;;  %v386_v53 = vpop.permute.xlu0 %385 }
  0x7d   :  { %1707 = vmatmul.mubr.msk.f32.vlgmr.msra.gmra.mrb[0].mxu0 %vm68_vm5, %v50_v52  ;;  %1747 = vmatmul.mubr.msk.f32.vlgmr.msra.gmra.mrb[0].mxu1 %vm387_vm6, %v386_v53 }
  0x7e   :  { %2089 = vmatpush3.bf16.msra.mxu0 %v2088_v46  ;;  %2152 = vmatpush3.bf16.msra.mxu1 %v2151_v47  ;;  %v2157_v46 = vpack.c.bf16 %v549_v38, %v548_v37  ;;  %v641_v37 = vld [vmem:[%s3209_s2 + $0x80] sm:$0xff] }
  0x7f   :  { %2091 = vmatprep.subr.bf16.mxu0 %v2090_v49  ;;  %2153 = vmatprep.subr.bf16.mxu1 %v2411_v29 }
  0x80   :  { %1757 = vmatprep.mubr.msk.f32.mxu1 %vm2409_vm2, %v2408_v19 }
  0x82   :  { %2093 = vmatpush3.bf16.msra.mxu0 %v2092_v56  ;;  %2155 = vmatpush3.bf16.msra.mxu1 %v2154_v26  ;;  %v634_v26 = vld [vmem:[%s3209_s2 + $0x48] sm:$0xff] }
  0x83   :  { %2095 = vmatprep.subr.bf16.mxu0 %v2094_v57  ;;  %2156 = vmatprep.subr.bf16.mxu1 %v2411_v29 }
  0x86   :  { %2097 = vmatpush3.bf16.msra.mxu0 %v2096_v62 }
  0x87   :  { %2099 = vmatprep.subr.bf16.mxu0 %v2098_v63 }
  0x8a   :  { %2101 = vmatpush3.bf16.msra.mxu0 %v2100_v4  ;;  %v210_v4 = vld [vmem:[%s3208_s1 + $0x1a8] sm:$0xff] }
  0x8b   :  { %2103 = vmatprep.subr.bf16.mxu0 %v2102_v5  ;;  %v211_v5 = vld [vmem:[%s3208_s1 + $0x1b0] sm:$0xff] }
  0x8c   :  { %v2134_v6 = vpack.c.bf16 %v211_v5, %v210_v4  ;;  %v904_v5 = vld [vmem:[%s3209_s2 + $0x1e8] sm:$0xff] }
  0x8e   :  { %2105 = vmatpush3.bf16.msra.mxu0 %v2104_v10  ;;  %v214_v10 = vld [vmem:[%s3208_s1 + $0x1c8] sm:$0xff] }
  0x8f   :  { %2107 = vmatprep.subr.bf16.mxu0 %v2106_v11  ;;  %v215_v11 = vld [vmem:[%s3208_s1 + $0x1d0] sm:$0xff] }
  0x90   :  { %v2142_v12 = vpack.c.bf16 %v215_v11, %v214_v10  ;;  %v908_v11 = vld [vmem:[%s3209_s2 + $0x208] sm:$0xff] }
  0x92   :  { %2109 = vmatpush3.bf16.msra.mxu0 %v2108_v14  ;;  %v217_v14 = vld [vmem:[%s3208_s1 + $0x1e0] sm:$0xff] }
  0x93   :  { %2111 = vmatprep.subr.bf16.mxu0 %v2110_v17  ;;  %v2146_v15 = vpack.c.bf16 %v217_v14, %v216_v13  ;;  %v551_v17 = vld [vmem:[%s3209_s2 + $0x440] sm:$0xff]  ;;  %v910_v14 = vld [vmem:[%s3209_s2 + $0x218] sm:$0xff] }
  0x94   :  { %v2160_v18 = vpack.c.bf16 %v551_v17, %v550_v16  ;;  %v1447_v17 = vld [vmem:[%s3208_s1 + $0x61] ss:$0 sm:$0xff] }
  0x96   :  { %2113 = vmatpush3.bf16.msra.mxu0 %v2112_v21  ;;  %v631_v21 = vld [vmem:[%s3209_s2 + $0x30] sm:$0xff] }
  0x97   :  { %2115 = vmatprep.subr.bf16.mxu0 %v2114_v27  ;;  %v2163_v22 = vpack.c.bf16 %v631_v21, %v630_v20  ;;  %v635_v27 = vld [vmem:[%s3209_s2 + $0x50] sm:$0xff] }
  0x98   :  { %v2169_v28 = vpack.c.bf16 %v635_v27, %v634_v26  ;;  %v985_v27 = vld [vmem:[%s3209_s2 + $0x228] sm:$0xff] }
  0x9a   :  { %2117 = vmatpush3.bf16.msra.mxu0 %v2116_v31  ;;  %v637_v31 = vld [vmem:[%s3209_s2 + $0x60] sm:$0xff] }
  0x9b   :  { %2119 = vmatprep.subr.bf16.mxu0 %v2118_v34  ;;  %v2172_v32 = vpack.c.bf16 %v637_v31, %v636_v30 }
 0x150   :  { %v1708_v39 = vpop.f32.mrb[0].mxu0  ;;  %v456_v40 = vpop.f32.mrb[0].mxu1 }
 0x151   :  { %v147_v41 = vadd.f32 %v1708_v39, %v1444_v35  ;;  %v457_v42 = vadd.f32 %v1451_v36, %v456_v40  ;;  %v141_v43 = vpop.f32.mrb[1].mxu0  ;;  %v1748_v44 = vpop.f32.mrb[1].mxu1  ;;  %v640_v36 = vld [vmem:[%s3209_s2 + $0x78] sm:$0xff]  ;;  %v642_v39 = vld [vmem:[%s3209_s2 + $0x88] sm:$0xff]  ;;  %v643_v40 = vld [vmem:[%s3209_s2 + $0x90] sm:$0xff] }
 0x152   :  { %v142_v45 = vadd.f32 %v1444_v35, %v141_v43  ;;  %v2178_v38 = vpack.c.bf16 %v641_v37, %v640_v36  ;;  %v645_v43 = vld [vmem:[%s3209_s2 + $0xa0] sm:$0xff]  ;;  %v987_v37 = vld [vmem:[%s3209_s2 + $0x238] sm:$0xff] }
 0x153   :  { %v153_v47 = vmul.f32 0.01, %v147_v41  ;;  %vm460_vm7 = vcmp.ge.f32.partialorder %v457_v42, 0.0  ;;  %v461_v48 = vmul.f32 0.01, %v457_v42  ;;  %vm151_vm8 = vcmp.ge.f32.partialorder %v147_v41, 0.0 }
 0x154   :  { %v152_v49 = vmul.f32 0.01, %v142_v45  ;;  %vm150_vm9 = vcmp.ge.f32.partialorder %v142_v45, 0.0 }
 0x155   :  { %v462_v52 = vsel %vm460_vm7, %v457_v42, %v461_v48  ;;  %v155_v53 = vsel %vm151_vm8, %v147_v41, %v153_v47  ;;  %v2181_v41 = vpack.c.bf16 %v643_v40, %v642_v39  ;;  %v644_v42 = vld [vmem:[%s3209_s2 + $0x98] sm:$0xff]  ;;  %v896_v47 = vld [vmem:[%s3209_s2 + $0x1a8] sm:$0xff]  ;;  %v897_v48 = vld [vmem:[%s3209_s2 + $0x1b0] sm:$0xff] }
 0x156   :  { %1758 = vmatmul.mubr.msk.f32.vlgmr.msra.gmra.mrb[2].mxu1 %vm45_vm3, %v462_v52  ;;  %v154_v54 = vsel %vm150_vm9, %v142_v45, %v152_v49  ;;  %v159_v55 = vrot.slane %v155_v53, 6  ;;  %v165_v56 = vrot.slane %v155_v53, 2  ;;  %v2184_v44 = vpack.c.bf16 %v645_v43, %v644_v42  ;;  %v1453_v45 = vld [vmem:[%s3209_s2 + $0x469] ss:$0 sm:$0xff] }
 0x157   :  { %v158_v57 = vrot.slane %v154_v54, 6  ;;  %v164_v58 = vrot.slane %v154_v54, 2  ;;  %287 = vmatprep.mubr.f32.mxu0 %v154_v54  ;;  %2158 = vmatpush3.bf16.msra.mxu1 %v2157_v46  ;;  %v721_v40 = vld [vmem:[%s3209_s2 + $0xc8] sm:$0xff] }
 0x158   :  { %2159 = vmatprep.subr.bf16.mxu1 %v2411_v29  ;;  %1768 = vmatprep.mubr.msk.f32.mxu1 %vm2409_vm2, %v2408_v19  ;;  %v989_v43 = vld [vmem:[%s3209_s2 + $0x248] sm:$0xff] }
 0x159   :  { %1449 = vmatmul.mubr.msk.f32.vlgmr.msra.gmra.mrb[2].mxu0 %vm1448_vm10, %v158_v57  ;;  %v160_v62 = vsel %vm19_vm1, %v158_v57, %v159_v55  ;;  %v166_v63 = vsel %vm26_vm0, %v164_v58, %v165_v56  ;;  %v898_v55 = vld [vmem:[%s3209_s2 + $0x1b8] sm:$0xff] }
 0x15a   :  { %2121 = vmatpush3.bf16.msra.mxu0 %v2118_v34  ;;  %292 = vmatprep.mubr.f32.mxu0 %v155_v53  ;;  %v639_v34 = vld [vmem:[%s3209_s2 + $0x70] sm:$0xff]  ;;  %v2235_v53 = vpack.c.bf16 %v897_v48, %v896_v47  ;;  %v724_v47 = vld [vmem:[%s3209_s2 + $0xe0] sm:$0xff] }
 0x15b   :  { %2123 = vmatprep.subr.bf16.mxu0 %v2122_v59  ;;  %2161 = vmatpush3.bf16.msra.mxu1 %v2160_v18  ;;  %v2175_v35 = vpack.c.bf16 %v639_v34, %v638_v33  ;;  %v720_v33 = vld [vmem:[%s3209_s2 + $0xc0] sm:$0xff] }
 0x15c   :  { %2234 = vmatprep.subr.bf16.mxu1 %v2411_v29 }
 0x15d   :  { %293 = vmatmul.mubr.f32.gmra.mrb[4].mxu0 %v160_v62  ;;  %v900_v62 = vld [vmem:[%s3209_s2 + $0x1c8] sm:$0xff] }
 0x15e   :  { %2125 = vmatpush3.bf16.msra.mxu0 %v2122_v59  ;;  %1741 = vmatprep.mubr.f32.mxu0 %v166_v63  ;;  %v901_v63 = vld [vmem:[%s3209_s2 + $0x1d0] sm:$0xff] }
 0x15f   :  { %2127 = vmatprep.subr.bf16.mxu0 %v2126_v0  ;;  %v2241_v1 = vpack.c.bf16 %v901_v63, %v900_v62  ;;  %v996_v62 = vld [vmem:[%s3209_s2 + $0x280] sm:$0xff] }
 0x162   :  { %2129 = vmatpush3.bf16.msra.mxu0 %v2126_v0 }
 0x163   :  { %2131 = vmatprep.subr.bf16.mxu0 %v2130_v3 }
 0x166   :  { %2133 = vmatpush3.bf16.msra.mxu0 %v2130_v3  ;;  %v903_v3 = vld [vmem:[%s3209_s2 + $0x1e0] sm:$0xff] }
 0x167   :  { %2135 = vmatprep.subr.bf16.mxu0 %v2134_v6  ;;  %v2244_v4 = vpack.c.bf16 %v903_v3, %v902_v2  ;;  %v997_v3 = vld [vmem:[%s3209_s2 + $0x288] sm:$0xff] }
 0x16a   :  { %2137 = vmatpush3.bf16.msra.mxu0 %v2134_v6  ;;  %v905_v6 = vld [vmem:[%s3209_s2 + $0x1f0] sm:$0xff] }
 0x16b   :  { %2139 = vmatprep.subr.bf16.mxu0 %v2138_v9  ;;  %v2247_v7 = vpack.c.bf16 %v905_v6, %v904_v5  ;;  %v731_v6 = vld [vmem:[%s3209_s2 + $0x118] sm:$0xff] }
 0x16e   :  { %2141 = vmatpush3.bf16.msra.mxu0 %v2138_v9  ;;  %v907_v9 = vld [vmem:[%s3209_s2 + $0x200] sm:$0xff] }
 0x16f   :  { %2143 = vmatprep.subr.bf16.mxu0 %v2142_v12  ;;  %v2250_v10 = vpack.c.bf16 %v907_v9, %v906_v8  ;;  %v999_v9 = vld [vmem:[%s3209_s2 + $0x298] sm:$0xff] }
 0x172   :  { %2145 = vmatpush3.bf16.msra.mxu0 %v2142_v12  ;;  %v909_v12 = vld [vmem:[%s3209_s2 + $0x210] sm:$0xff] }
 0x173   :  { %2147 = vmatprep.subr.bf16.mxu0 %v2146_v15  ;;  %v2253_v13 = vpack.c.bf16 %v909_v12, %v908_v11  ;;  %v807_v12 = vld [vmem:[%s3209_s2 + $0x128] sm:$0xff] }
 0x176   :  { %2149 = vmatpush3.bf16.msra.mxu0 %v2146_v15  ;;  %v911_v15 = vld [vmem:[%s3209_s2 + $0x220] sm:$0xff] }
 0x177   :  { %2162 = vmatprep.subr.bf16.mxu0 %v2411_v29  ;;  %v2256_v16 = vpack.c.bf16 %v911_v15, %v910_v14  ;;  %v1072_v15 = vld [vmem:[%s3209_s2 + $0x2a8] sm:$0xff] }
 0x179   :  { %1742 = vmatmul.mubr.msk.f32.vlgmr.msra.gmra.mrb[6].mxu0 %vm26_vm0, %v165_v56  ;;  %v899_v56 = vld [vmem:[%s3209_s2 + $0x1c0] sm:$0xff]  ;;  %vm1428_vm0 = vcmask 254976  }
 0x17a   :  { %1803 = vmatprep.mubr.msk.f32.mxu0 %vm2409_vm2, %v2408_v19  ;;  %2164 = vmatpush3.bf16.msra.mxu0 %v2163_v22  ;;  %v2238_v60 = vpack.c.bf16 %v899_v56, %v898_v55  ;;  %v993_v55 = vld [vmem:[%s3209_s2 + $0x268] sm:$0xff]  ;;  %v994_v56 = vld [vmem:[%s3209_s2 + $0x270] sm:$0xff] }
 0x17b   :  { %2165 = vmatprep.subr.bf16.mxu0 %v2411_v29 }
 0x17e   :  { %2167 = vmatpush3.bf16.msra.mxu0 %v2166_v25  ;;  %v718_v25 = vld [vmem:[%s3209_s2 + $0xb0] sm:$0xff] }
 0x17f   :  { %2168 = vmatprep.subr.bf16.mxu0 %v2411_v29  ;;  %v2187_v31 = vpack.c.bf16 %v718_v25, %v717_v24  ;;  %v1074_v25 = vld [vmem:[%s3209_s2 + $0x2b8] sm:$0xff] }
 0x182   :  { %2170 = vmatpush3.bf16.msra.mxu0 %v2169_v28  ;;  %v986_v28 = vld [vmem:[%s3209_s2 + $0x230] sm:$0xff] }
 0x183   :  { %2171 = vmatprep.subr.bf16.mxu0 %v2411_v29 }
 0x186   :  { %2173 = vmatpush3.bf16.msra.mxu0 %v2172_v32  ;;  %v719_v32 = vld [vmem:[%s3209_s2 + $0xb8] sm:$0xff] }
 0x187   :  { %2174 = vmatprep.subr.bf16.mxu0 %v2411_v29  ;;  %v2190_v39 = vpack.c.bf16 %v720_v33, %v719_v32  ;;  %v1077_v33 = vld [vmem:[%s3209_s2 + $0x2d0] sm:$0xff] }
 0x18a   :  { %2176 = vmatpush3.bf16.msra.mxu0 %v2175_v35  ;;  %v2259_v35 = vpack.c.bf16 %v986_v28, %v985_v27 }
 0x18b   :  { %2177 = vmatprep.subr.bf16.mxu0 %v2411_v29 }
 0x18e   :  { %2179 = vmatpush3.bf16.msra.mxu0 %v2178_v38  ;;  %v988_v38 = vld [vmem:[%s3209_s2 + $0x240] sm:$0xff] }
 0x18f   :  { %2180 = vmatprep.subr.bf16.mxu0 %v2411_v29  ;;  %v2262_v42 = vpack.c.bf16 %v988_v38, %v987_v37  ;;  %v814_v37 = vld [vmem:[%s3209_s2 + $0x160] sm:$0xff] }
 0x192   :  { %2182 = vmatpush3.bf16.msra.mxu0 %v2181_v41  ;;  %v722_v41 = vld [vmem:[%s3209_s2 + $0xd0] sm:$0xff] }
 0x193   :  { %2183 = vmatprep.subr.bf16.mxu0 %v2411_v29 }
 0x196   :  { %2185 = vmatpush3.bf16.msra.mxu0 %v2184_v44  ;;  %v990_v44 = vld [vmem:[%s3209_s2 + $0x250] sm:$0xff] }
 0x197   :  { %2186 = vmatprep.subr.bf16.mxu0 %v2411_v29  ;;  %v2265_v48 = vpack.c.bf16 %v990_v44, %v989_v43  ;;  %v816_v43 = vld [vmem:[%s3209_s2 + $0x170] sm:$0xff] }
 0x229   :  { %v541_v46 = vpop.f32.mrb[2].mxu1 }
 0x22a   :  { %v542_v49 = vadd.f32 %v1453_v45, %v541_v46  ;;  %v1759_v50 = vpop.f32.mrb[3].mxu1  ;;  %v2193_v45 = vpack.c.bf16 %v722_v41, %v721_v40  ;;  %v723_v46 = vld [vmem:[%s3209_s2 + $0xd8] sm:$0xff]  ;;  %v1079_v40 = vld [vmem:[%s3209_s2 + $0x2e0] sm:$0xff] }
 0x22b   :  { %v992_v50 = vld [vmem:[%s3209_s2 + $0x260] sm:$0xff] }
 0x22c   :  { %vm545_vm11 = vcmp.ge.f32.partialorder %v542_v49, 0.0  ;;  %v546_v51 = vmul.f32 0.01, %v542_v49  ;;  %v1505_v52 = vpop.f32.mrb[2].mxu0 }
 0x22d   :  { %v1506_v54 = vpop.f32.mrb[3].mxu0 }
 0x22e   :  { %v547_v57 = vsel %vm545_vm11, %v542_v49, %v546_v51  ;;  %v1507_v58 = vadd.f32 %v1506_v54, %v1505_v52  ;;  %v991_v49 = vld [vmem:[%s3209_s2 + $0x258] sm:$0xff]  ;;  %v2196_v51 = vpack.c.bf16 %v724_v47, %v723_v46  ;;  %v725_v52 = vld [vmem:[%s3209_s2 + $0xe8] sm:$0xff]  ;;  %v1081_v46 = vld [vmem:[%s3209_s2 + $0x2f0] sm:$0xff] }
 0x22f   :  { %1769 = vmatmul.mubr.msk.f32.vlgmr.msra.gmra.mrb[4].mxu1 %vm45_vm3, %v547_v57  ;;  %v2268_v54 = vpack.c.bf16 %v992_v50, %v991_v49  ;;  %v818_v49 = vld [vmem:[%s3209_s2 + $0x180] sm:$0xff] }
 0x230   :  { %v1508_v59 = vpop.f32.mrb[4].mxu0  ;;  %2236 = vmatpush3.bf16.msra.mxu1 %v2235_v53  ;;  %1908 = vmatprep.mubr.msk.f32.mxu1 %vm2409_vm2, %v2408_v19  ;;  %v290_v21 = vadd.f32 %v1507_v58, %v1447_v17  ;;  %v726_v53 = vld [vmem:[%s3209_s2 + $0xf0] sm:$0xff]  ;;  %v727_v58 = vld [vmem:[%s3209_s2 + $0xf8] sm:$0xff] }
 0x231   :  { %v1509_v61 = vpop.f32.mrb[5].mxu0  ;;  %2237 = vmatprep.subr.bf16.mxu1 %v2411_v29  ;;  %v2199_v57 = vpack.c.bf16 %v726_v53, %v725_v52  ;;  %v1083_v52 = vld [vmem:[%s3209_s2 + $0x300] sm:$0xff] }
 0x232   :  { %v1510_v0 = vadd.f32 %v1509_v61, %v1508_v59  ;;  %v728_v59 = vld [vmem:[%s3209_s2 + $0x100] sm:$0xff]  ;;  %v995_v61 = vld [vmem:[%s3209_s2 + $0x278] sm:$0xff] }
 0x233   :  { %v2202_v63 = vpack.c.bf16 %v728_v59, %v727_v58  ;;  %v2274_v2 = vpack.c.bf16 %v996_v62, %v995_v61  ;;  %v1085_v58 = vld [vmem:[%s3209_s2 + $0x310] sm:$0xff]  ;;  %v822_v61 = vld [vmem:[%s3209_s2 + $0x1a0] sm:$0xff] }
 0x234   :  { %2239 = vmatpush3.bf16.msra.mxu1 %v2238_v60  ;;  %v295_v18 = vadd.f32 %v1510_v0, %v1447_v17  ;;  %v2271_v60 = vpack.c.bf16 %v994_v56, %v993_v55  ;;  %v729_v0 = vld [vmem:[%s3209_s2 + $0x108] sm:$0xff]  ;;  %v820_v55 = vld [vmem:[%s3209_s2 + $0x190] sm:$0xff] }
 0x235   :  { %2240 = vmatprep.subr.bf16.mxu1 %v2411_v29 }
 0x238   :  { %2242 = vmatpush3.bf16.msra.mxu1 %v2241_v1  ;;  %v730_v1 = vld [vmem:[%s3209_s2 + $0x110] sm:$0xff] }
 0x239   :  { %2243 = vmatprep.subr.bf16.mxu1 %v2411_v29  ;;  %v2205_v5 = vpack.c.bf16 %v730_v1, %v729_v0  ;;  %v1087_v0 = vld [vmem:[%s3209_s2 + $0x320] sm:$0xff] }
 0x23c   :  { %2245 = vmatpush3.bf16.msra.mxu1 %v2244_v4  ;;  %v998_v4 = vld [vmem:[%s3209_s2 + $0x290] sm:$0xff] }
 0x23d   :  { %2246 = vmatprep.subr.bf16.mxu1 %v2411_v29  ;;  %v2277_v8 = vpack.c.bf16 %v998_v4, %v997_v3  ;;  %v1162_v3 = vld [vmem:[%s3209_s2 + $0x328] sm:$0xff]  ;;  %v1163_v4 = vld [vmem:[%s3209_s2 + $0x330] sm:$0xff] }
 0x240   :  { %2248 = vmatpush3.bf16.msra.mxu1 %v2247_v7  ;;  %v732_v7 = vld [vmem:[%s3209_s2 + $0x120] sm:$0xff] }
 0x241   :  { %2249 = vmatprep.subr.bf16.mxu1 %v2411_v29  ;;  %v2208_v11 = vpack.c.bf16 %v732_v7, %v731_v6  ;;  %v2307_v6 = vpack.c.bf16 %v1163_v4, %v1162_v3 }
 0x244   :  { %2251 = vmatpush3.bf16.msra.mxu1 %v2250_v10  ;;  %v1000_v10 = vld [vmem:[%s3209_s2 + $0x2a0] sm:$0xff] }
 0x245   :  { %2252 = vmatprep.subr.bf16.mxu1 %v2411_v29  ;;  %v2280_v14 = vpack.c.bf16 %v1000_v10, %v999_v9  ;;  %v1165_v9 = vld [vmem:[%s3209_s2 + $0x340] sm:$0xff] }
 0x248   :  { %2254 = vmatpush3.bf16.msra.mxu1 %v2253_v13  ;;  %v808_v13 = vld [vmem:[%s3209_s2 + $0x130] sm:$0xff] }
 0x249   :  { %2255 = vmatprep.subr.bf16.mxu1 %v2411_v29 }
 0x24c   :  { %v1743_v20 = vpop.f32.mrb[6].mxu0  ;;  %2257 = vmatpush3.bf16.msra.mxu1 %v2256_v16  ;;  %v1073_v16 = vld [vmem:[%s3209_s2 + $0x2b0] sm:$0xff] }
 0x24d   :  { %v2808_v22 = vadd.f32 %v1743_v20, %v295_v18  ;;  %v364_v23 = vpop.f32.mrb[7].mxu0  ;;  %2258 = vmatprep.subr.bf16.mxu1 %v2411_v29  ;;  %v2211_v18 = vpack.c.bf16 %v808_v13, %v807_v12  ;;  %v2283_v24 = vpack.c.bf16 %v1073_v16, %v1072_v15  ;;  %v1168_v13 = vld [vmem:[%s3209_s2 + $0x358] sm:$0xff]  ;;  %v1170_v16 = vld [vmem:[%s3209_s2 + $0x368] sm:$0xff] }
 0x24e   :  { %v365_v26 = vadd.f32 %v364_v23, %v290_v21  ;;  %v809_v21 = vld [vmem:[%s3209_s2 + $0x138] sm:$0xff]  ;;  %v810_v23 = vld [vmem:[%s3209_s2 + $0x140] sm:$0xff] }
 0x24f   :  { %v376_v17 = vmul.f32 0.01, %v2808_v22  ;;  %vm374_vm13 = vcmp.ge.f32.partialorder %v2808_v22, 0.0  ;;  %v2214_v28 = vpack.c.bf16 %v810_v23, %v809_v21  ;;  %v1173_v21 = vld [vmem:[%s3209_s2 + $0x380] sm:$0xff] }
 0x250   :  { %vm373_vm12 = vcmp.ge.f32.partialorder %v365_v26, 0.0  ;;  %v375_v30 = vmul.f32 0.01, %v365_v26 }
 0x251   :  { %v2959_v27 = vsel %vm374_vm13, %v2808_v22, %v376_v17  ;;  %v1076_v22 = vld [vmem:[%s3209_s2 + $0x2c8] sm:$0xff]  ;;  %v1171_v17 = vld [vmem:[%s3209_s2 + $0x370] sm:$0xff] }
 0x252   :  { %v2829_v34 = vsel %vm373_vm12, %v365_v26, %v375_v30  ;;  %v1075_v26 = vld [vmem:[%s3209_s2 + $0x2c0] sm:$0xff]  ;;  %v811_v30 = vld [vmem:[%s3209_s2 + $0x148] sm:$0xff]  ;;  %v2289_v38 = vpack.c.bf16 %v1077_v33, %v1076_v22  ;;  %v1089_v7 = vrot.slane %v2959_v27, 2  ;;  %v1252_v22 = vld [vmem:[%s3209_s2 + $0x3b0] sm:$0xff] }
 0x253   :  { %1804 = vmatmul.mubr.f32.vlgmr.msra.gmra.mrb[8].mxu0 %v2829_v34  ;;  %v912_v36 = vrot.slane %v2829_v34, 6  ;;  %v734_v20 = vrot.slane %v2829_v34, 2  ;;  %v2286_v32 = vpack.c.bf16 %v1075_v26, %v1074_v25  ;;  %v1175_v25 = vld [vmem:[%s3209_s2 + $0x390] sm:$0xff] }
 0x254   :  { %2188 = vmatpush3.bf16.msra.mxu0 %v2187_v31  ;;  %1838 = vmatprep.mubr.msk.f32.mxu0 %vm2409_vm2, %v2408_v19  ;;  %v812_v31 = vld [vmem:[%s3209_s2 + $0x150] sm:$0xff] }
 0x255   :  { %1909 = vmatmul.mubr.f32.vlgmr.msra.gmra.mrb[6].mxu1 %v912_v36  ;;  %2189 = vmatprep.subr.bf16.mxu0 %v2411_v29  ;;  %v813_v36 = vld [vmem:[%s3209_s2 + $0x158] sm:$0xff] }
 0x256   :  { %2260 = vmatpush3.bf16.msra.mxu1 %v2259_v35  ;;  %1943 = vmatprep.mubr.msk.f32.mxu1 %vm2409_vm2, %v2408_v19  ;;  %v2217_v35 = vpack.c.bf16 %v812_v31, %v811_v30  ;;  %v2220_v41 = vpack.c.bf16 %v814_v37, %v813_v36  ;;  %v1177_v30 = vld [vmem:[%s3209_s2 + $0x3a0] sm:$0xff]  ;;  %v1253_v36 = vld [vmem:[%s3209_s2 + $0x3b8] sm:$0xff] }
 0x257   :  { %2261 = vmatprep.subr.bf16.mxu1 %v2411_v29  ;;  %v1254_v37 = vld [vmem:[%s3209_s2 + $0x3c0] sm:$0xff] }
 0x258   :  { %2191 = vmatpush3.bf16.msra.mxu0 %v2190_v39  ;;  %v1078_v39 = vld [vmem:[%s3209_s2 + $0x2d8] sm:$0xff] }
 0x259   :  { %2192 = vmatprep.subr.bf16.mxu0 %v2411_v29  ;;  %v2292_v44 = vpack.c.bf16 %v1079_v40, %v1078_v39  ;;  %v1255_v39 = vld [vmem:[%s3209_s2 + $0x3c8] sm:$0xff]  ;;  %v1256_v40 = vld [vmem:[%s3209_s2 + $0x3d0] sm:$0xff] }
 0x25a   :  { %2263 = vmatpush3.bf16.msra.mxu1 %v2262_v42  ;;  %v815_v42 = vld [vmem:[%s3209_s2 + $0x168] sm:$0xff] }
 0x25b   :  { %2264 = vmatprep.subr.bf16.mxu1 %v2411_v29  ;;  %v2223_v47 = vpack.c.bf16 %v816_v43, %v815_v42  ;;  %v1257_v42 = vld [vmem:[%s3209_s2 + $0x3d8] sm:$0xff]  ;;  %v1258_v43 = vld [vmem:[%s3209_s2 + $0x3e0] sm:$0xff] }
 0x25c   :  { %2194 = vmatpush3.bf16.msra.mxu0 %v2193_v45  ;;  %v1080_v45 = vld [vmem:[%s3209_s2 + $0x2e8] sm:$0xff] }
 0x25d   :  { %2195 = vmatprep.subr.bf16.mxu0 %v2411_v29  ;;  %v2295_v50 = vpack.c.bf16 %v1081_v46, %v1080_v45  ;;  %v1259_v45 = vld [vmem:[%s3209_s2 + $0x3e8] sm:$0xff]  ;;  %v1260_v46 = vld [vmem:[%s3209_s2 + $0x3f0] sm:$0xff] }
 0x25e   :  { %2266 = vmatpush3.bf16.msra.mxu1 %v2265_v48  ;;  %v817_v48 = vld [vmem:[%s3209_s2 + $0x178] sm:$0xff] }
 0x25f   :  { %2267 = vmatprep.subr.bf16.mxu1 %v2411_v29  ;;  %v2226_v53 = vpack.c.bf16 %v818_v49, %v817_v48  ;;  %v1261_v48 = vld [vmem:[%s3209_s2 + $0x3f8] sm:$0xff]  ;;  %v1262_v49 = vld [vmem:[%s3209_s2 + $0x400] sm:$0xff] }
 0x260   :  { %2197 = vmatpush3.bf16.msra.mxu0 %v2196_v51  ;;  %v1082_v51 = vld [vmem:[%s3209_s2 + $0x2f8] sm:$0xff] }
 0x261   :  { %2198 = vmatprep.subr.bf16.mxu0 %v2411_v29  ;;  %v2298_v56 = vpack.c.bf16 %v1083_v52, %v1082_v51  ;;  %v1263_v51 = vld [vmem:[%s3209_s2 + $0x408] sm:$0xff]  ;;  %v1264_v52 = vld [vmem:[%s3209_s2 + $0x410] sm:$0xff] }
 0x262   :  { %2269 = vmatpush3.bf16.msra.mxu1 %v2268_v54  ;;  %v819_v54 = vld [vmem:[%s3209_s2 + $0x188] sm:$0xff] }
 0x263   :  { %2270 = vmatprep.subr.bf16.mxu1 %v2411_v29  ;;  %v2229_v59 = vpack.c.bf16 %v820_v55, %v819_v54  ;;  %v1265_v54 = vld [vmem:[%s3209_s2 + $0x418] sm:$0xff]  ;;  %v1266_v55 = vld [vmem:[%s3209_s2 + $0x420] sm:$0xff] }
 0x264   :  { %2200 = vmatpush3.bf16.msra.mxu0 %v2199_v57  ;;  %v1084_v57 = vld [vmem:[%s3209_s2 + $0x308] sm:$0xff] }
 0x265   :  { %2201 = vmatprep.subr.bf16.mxu0 %v2411_v29  ;;  %v2301_v62 = vpack.c.bf16 %v1085_v58, %v1084_v57  ;;  %v1267_v57 = vrot.slane %v2959_v27, 6  ;;  %v1343_v58 = vld [vmem:[%s3209_s2 + $0x448] sm:$0xff] }
 0x266   :  { %2272 = vmatpush3.bf16.msra.mxu1 %v2271_v60  ;;  %v821_v60 = vld [vmem:[%s3209_s2 + $0x198] sm:$0xff] }
 0x267   :  { %2273 = vmatprep.subr.bf16.mxu1 %v2411_v29  ;;  %v2232_v1 = vpack.c.bf16 %v822_v61, %v821_v60 }
 0x268   :  { %2203 = vmatpush3.bf16.msra.mxu0 %v2202_v63  ;;  %v1086_v63 = vld [vmem:[%s3209_s2 + $0x318] sm:$0xff] }
 0x269   :  { %2204 = vmatprep.subr.bf16.mxu0 %v2411_v29 }
 0x26a   :  { %2275 = vmatpush3.bf16.msra.mxu1 %v2274_v2  ;;  %v2304_v2 = vpack.c.bf16 %v1087_v0, %v1086_v63  ;;  %v1455_v0 = vld [vmem:[%s3209_s2 + $0x46a] ss:$0 sm:$0xff] }
 0x26b   :  { %2276 = vmatprep.subr.bf16.mxu1 %v2411_v29 }
 0x26c   :  { %2206 = vmatpush3.bf16.msra.mxu0 %v2205_v5  ;;  %v823_v5 = vrot.slane %v2829_v34, 4  ;;  %v1166_v34 = vld [vmem:[%s3209_s2 + $0x348] sm:$0xff] }
 0x26d   :  { %2207 = vmatprep.subr.bf16.mxu0 %v2411_v29 }
 0x26e   :  { %2278 = vmatpush3.bf16.msra.mxu1 %v2277_v8  ;;  %v1164_v8 = vld [vmem:[%s3209_s2 + $0x338] sm:$0xff] }
 0x26f   :  { %2279 = vmatprep.subr.bf16.mxu1 %v2411_v29  ;;  %v2310_v10 = vpack.c.bf16 %v1165_v9, %v1164_v8  ;;  %v1457_v9 = vld [vmem:[%s3209_s2 + $0x46b] ss:$0 sm:$0xff] }
 0x270   :  { %2209 = vmatpush3.bf16.msra.mxu0 %v2208_v11  ;;  %v1167_v11 = vld [vmem:[%s3209_s2 + $0x350] sm:$0xff] }
 0x271   :  { %2210 = vmatprep.subr.bf16.mxu0 %v2411_v29  ;;  %v2313_v12 = vpack.c.bf16 %v1167_v11, %v1166_v34 }
 0x272   :  { %2281 = vmatpush3.bf16.msra.mxu1 %v2280_v14  ;;  %v1169_v14 = vld [vmem:[%s3209_s2 + $0x360] sm:$0xff] }
 0x273   :  { %1839 = vmatmul.mubr.f32.vlgmr.msra.gmra.mrb[8].mxu0 %v734_v20  ;;  %2282 = vmatprep.subr.bf16.mxu1 %v2411_v29  ;;  %v2316_v15 = vpack.c.bf16 %v1169_v14, %v1168_v13  ;;  %v1172_v20 = vld [vmem:[%s3209_s2 + $0x378] sm:$0xff] }
 0x274   :  { %2212 = vmatpush3.bf16.msra.mxu0 %v2211_v18  ;;  %1873 = vmatprep.mubr.msk.f32.mxu0 %vm2409_vm2, %v2408_v19  ;;  %v2319_v18 = vpack.c.bf16 %v1171_v17, %v1170_v16  ;;  %v2322_v23 = vpack.c.bf16 %v1173_v21, %v1172_v20 }
 0x275   :  { %1944 = vmatmul.mubr.f32.vlgmr.msra.gmra.mrb[6].mxu1 %v2959_v27  ;;  %2213 = vmatprep.subr.bf16.mxu0 %v2411_v29 }
 0x276   :  { %2284 = vmatpush3.bf16.msra.mxu1 %v2283_v24  ;;  %1978 = vmatprep.mubr.msk.f32.mxu1 %vm2409_vm2, %v2408_v19  ;;  %v1174_v24 = vld [vmem:[%s3209_s2 + $0x388] sm:$0xff] }
 0x277   :  { %2285 = vmatprep.subr.bf16.mxu1 %v2411_v29  ;;  %v2325_v26 = vpack.c.bf16 %v1175_v25, %v1174_v24 }
 0x278   :  { %2215 = vmatpush3.bf16.msra.mxu0 %v2214_v28  ;;  %v1176_v28 = vld [vmem:[%s3209_s2 + $0x398] sm:$0xff] }
 0x279   :  { %2216 = vmatprep.subr.bf16.mxu0 %v2411_v29  ;;  %v2328_v31 = vpack.c.bf16 %v1177_v30, %v1176_v28 }
 0x27a   :  { %2287 = vmatpush3.bf16.msra.mxu1 %v2286_v32  ;;  %v1251_v32 = vld [vmem:[%s3209_s2 + $0x3a8] sm:$0xff] }
 0x27b   :  { %2288 = vmatprep.subr.bf16.mxu1 %v2411_v29  ;;  %v2331_v33 = vpack.c.bf16 %v1252_v22, %v1251_v32 }
 0x27c   :  { %2218 = vmatpush3.bf16.msra.mxu0 %v2217_v35  ;;  %v1178_v35 = vrot.slane %v2959_v27, 4 }
 0x27d   :  { %2219 = vmatprep.subr.bf16.mxu0 %v2411_v29 }
 0x27e   :  { %2290 = vmatpush3.bf16.msra.mxu1 %v2289_v38  ;;  %v2334_v38 = vpack.c.bf16 %v1254_v37, %v1253_v36 }
 0x27f   :  { %2291 = vmatprep.subr.bf16.mxu1 %v2411_v29 }
 0x280   :  { %2221 = vmatpush3.bf16.msra.mxu0 %v2220_v41  ;;  %v2337_v41 = vpack.c.bf16 %v1256_v40, %v1255_v39 }
 0x281   :  { %2222 = vmatprep.subr.bf16.mxu0 %v2411_v29 }
 0x282   :  { %2293 = vmatpush3.bf16.msra.mxu1 %v2292_v44  ;;  %v2340_v44 = vpack.c.bf16 %v1258_v43, %v1257_v42 }
 0x283   :  { %2294 = vmatprep.subr.bf16.mxu1 %v2411_v29 }
 0x284   :  { %2224 = vmatpush3.bf16.msra.mxu0 %v2223_v47  ;;  %v2343_v47 = vpack.c.bf16 %v1260_v46, %v1259_v45 }
 0x285   :  { %2225 = vmatprep.subr.bf16.mxu0 %v2411_v29 }
 0x286   :  { %2296 = vmatpush3.bf16.msra.mxu1 %v2295_v50  ;;  %v2346_v50 = vpack.c.bf16 %v1262_v49, %v1261_v48 }
 0x287   :  { %2297 = vmatprep.subr.bf16.mxu1 %v2411_v29 }
 0x288   :  { %2227 = vmatpush3.bf16.msra.mxu0 %v2226_v53  ;;  %v2349_v53 = vpack.c.bf16 %v1264_v52, %v1263_v51 }
 0x289   :  { %2228 = vmatprep.subr.bf16.mxu0 %v2411_v29 }
 0x28a   :  { %2299 = vmatpush3.bf16.msra.mxu1 %v2298_v56  ;;  %v2352_v56 = vpack.c.bf16 %v1266_v55, %v1265_v54 }
 0x28b   :  { %2300 = vmatprep.subr.bf16.mxu1 %v2411_v29 }
 0x28c   :  { %2230 = vmatpush3.bf16.msra.mxu0 %v2229_v59  ;;  %v1344_v59 = vld [vmem:[%s3209_s2 + $0x450] sm:$0xff] }
 0x28d   :  { %2231 = vmatprep.subr.bf16.mxu0 %v2411_v29  ;;  %v2355_v60 = vpack.c.bf16 %v1344_v59, %v1343_v58 }
 0x28e   :  { %2302 = vmatpush3.bf16.msra.mxu1 %v2301_v62  ;;  %v1345_v62 = vld [vmem:[%s3209_s2 + $0x458] sm:$0xff] }
 0x28f   :  { %2303 = vmatprep.subr.bf16.mxu1 %v2411_v29 }
 0x290   :  { %2233 = vmatpush3.bf16.msra.mxu0 %v2232_v1 }
 0x292   :  { %2305 = vmatpush3.bf16.msra.mxu1 %v2304_v2 }
 0x293   :  { %1874 = vmatmul.mubr.f32.vlgmr.msra.gmra.mrb[8].mxu0 %v823_v5  ;;  %2306 = vmatprep.subr.bf16.mxu1 %v2411_v29 }
 0x295   :  { %1979 = vmatmul.mubr.f32.vlgmr.msra.gmra.mrb[6].mxu1 %v1089_v7 }
 0x296   :  { %2308 = vmatpush3.bf16.msra.mxu1 %v2307_v6  ;;  %2013 = vmatprep.mubr.msk.f32.mxu1 %vm2409_vm2, %v2408_v19 }
 0x297   :  { %2309 = vmatprep.subr.bf16.mxu1 %v2411_v29 }
 0x29a   :  { %2311 = vmatpush3.bf16.msra.mxu1 %v2310_v10 }
 0x29b   :  { %2312 = vmatprep.subr.bf16.mxu1 %v2411_v29 }
 0x29e   :  { %2314 = vmatpush3.bf16.msra.mxu1 %v2313_v12 }
 0x29f   :  { %2315 = vmatprep.subr.bf16.mxu1 %v2411_v29 }
 0x2a2   :  { %2317 = vmatpush3.bf16.msra.mxu1 %v2316_v15 }
 0x2a3   :  { %2318 = vmatprep.subr.bf16.mxu1 %v2411_v29 }
 0x2a6   :  { %2320 = vmatpush3.bf16.msra.mxu1 %v2319_v18 }
 0x2a7   :  { %2321 = vmatprep.subr.bf16.mxu1 %v2411_v29 }
 0x2aa   :  { %2323 = vmatpush3.bf16.msra.mxu1 %v2322_v23 }
 0x2ab   :  { %2324 = vmatprep.subr.bf16.mxu1 %v2411_v29 }
 0x2ae   :  { %2326 = vmatpush3.bf16.msra.mxu1 %v2325_v26 }
 0x2af   :  { %2327 = vmatprep.subr.bf16.mxu1 %v2411_v29 }
 0x2b2   :  { %2329 = vmatpush3.bf16.msra.mxu1 %v2328_v31 }
 0x2b3   :  { %2330 = vmatprep.subr.bf16.mxu1 %v2411_v29 }
 0x2b5   :  { %2014 = vmatmul.mubr.f32.vlgmr.msra.gmra.mrb[6].mxu1 %v1178_v35 }
 0x2b6   :  { %2332 = vmatpush3.bf16.msra.mxu1 %v2331_v33  ;;  %2048 = vmatprep.mubr.msk.f32.mxu1 %vm2409_vm2, %v2408_v19 }
 0x2b7   :  { %2333 = vmatprep.subr.bf16.mxu1 %v2411_v29 }
 0x2ba   :  { %2335 = vmatpush3.bf16.msra.mxu1 %v2334_v38 }
 0x2bb   :  { %2336 = vmatprep.subr.bf16.mxu1 %v2411_v29 }
 0x2be   :  { %2338 = vmatpush3.bf16.msra.mxu1 %v2337_v41 }
 0x2bf   :  { %2339 = vmatprep.subr.bf16.mxu1 %v2411_v29 }
 0x2c2   :  { %2341 = vmatpush3.bf16.msra.mxu1 %v2340_v44 }
 0x2c3   :  { %2342 = vmatprep.subr.bf16.mxu1 %v2411_v29 }
 0x2c6   :  { %2344 = vmatpush3.bf16.msra.mxu1 %v2343_v47 }
 0x2c7   :  { %2345 = vmatprep.subr.bf16.mxu1 %v2411_v29 }
 0x2ca   :  { %2347 = vmatpush3.bf16.msra.mxu1 %v2346_v50 }
 0x2cb   :  { %2348 = vmatprep.subr.bf16.mxu1 %v2411_v29 }
 0x2ce   :  { %2350 = vmatpush3.bf16.msra.mxu1 %v2349_v53 }
 0x2cf   :  { %2351 = vmatprep.subr.bf16.mxu1 %v2411_v29 }
 0x2d2   :  { %2353 = vmatpush3.bf16.msra.mxu1 %v2352_v56 }
 0x2d3   :  { %2354 = vmatprep.subr.bf16.mxu1 %v2411_v29 }
 0x2d5   :  { %2049 = vmatmul.mubr.f32.vlgmr.msra.gmra.mrb[6].mxu1 %v1267_v57 }
 0x2d6   :  { %2059 = vmatprep.mubr.msk.f32.mxu1 %vm2409_vm2, %v2408_v19  ;;  %2356 = vmatpush3.bf16.msra.mxu1 %v2355_v60  ;;  %v1346_v19 = vld [vmem:[%s3209_s2 + $0x460] sm:$0xff] }
 0x2d7   :  { %2357 = vmatprep.subr.bf16.mxu1 %v2411_v29  ;;  %v2358_v63 = vpack.c.bf16 %v1346_v19, %v1345_v62 }
 0x2da   :  { %2359 = vmatpush3.bf16.msra.mxu1 %v2358_v63 }
 0x302   :  { %v626_v61 = vpop.f32.mrb[4].mxu1 }
 0x303   :  { %v1770_v27 = vpop.f32.mrb[5].mxu1  ;;  %v627_v1 = vadd.f32 %v1455_v0, %v626_v61 }
 0x366   :  { %v891_v2 = vpop.f32.mrb[8].mxu0 }
 0x367   :  { %v2361_v3 = vadd.f32 %v891_v2, %v627_v1  ;;  %v1875_v29 = vpop.f32.mrb[9].mxu0 }
 0x3a8   :  { %v1335_v4 = vpop.f32.mrb[6].mxu1 }
 0x3a9   :  { %v2362_v5 = vadd.f32 %v2361_v3, %v1335_v4  ;;  %v2050_v6 = vpop.f32.mrb[7].mxu1 }
 0x3ab   :  { %vm1340_vm14 = vcmp.ge.f32.partialorder %v2362_v5, 0.0  ;;  %v1341_v7 = vmul.f32 0.01, %v2362_v5 }
 0x3ad   :  { %v1342_v8 = vsel %vm1340_vm14, %v2362_v5, %v1341_v7 }
 0x3ae   :  { %2060 = vmatmul.mubr.msk.f32.vlgmr.msra.gmra.mrb[8].mxu1 %vm45_vm3, %v1342_v8 }
 0x481   :  { %v1421_v10 = vpop.f32.mrb[8].mxu1 }
 0x482   :  { %v1422_v34 = vadd.f32 %v1457_v9, %v1421_v10  ;;  %v2061_v11 = vpop.f32.mrb[9].mxu1 }
 0x484   :  { %v1426_v12 = vmul.f32 0.01, %v1422_v34  ;;  %vm1425_vm15 = vcmp.ge.f32.partialorder %v1422_v34, 0.0 }
 0x486   :  { %v1427_v13 = vsel %vm1425_vm15, %v1422_v34, %v1426_v12 }
 0x487   :  { %1429 = vst.msk [vmem:[#allocation2] sm:$0x3] %vm1428_vm0, %v1427_v13 }
 0x488   :  { %2393 = shalt.err (!%p2390_p4)
}
 0x489   :  { %s2394_s9 = scalar_lea.hbm %s3210_s3, 32 }
 0x48a   :  { %p2395_p5 = scmp.ne.s32.totalorder %s3210_s3, %s2394_s9  ;;  %p2398_p6 = scmp.lt.u32.totalorder %s2394_s9, %s3210_s3 }
 0x48c   :  { %p2400_p7 = pnand %p2398_p6, %p2395_p5 }
 0x48e   :  { %2403 = shalt.err (!%p2400_p7)
}
 0x48f   :  { %1439 = dma.vmem_to_hbm [thread:$0]  %s1437_s7, 32, %s3210_s3, [#allocation3]  }
 0x490   :  { %2404 = dma.done.wait [#allocation3], 32  }
 0x491   :  { %2405 = vsyncadd [#allocation3], 4294967264 }
 0x492   :  { %1443 = vsyncpa [#allocation3], 1 }

</bundles_post_ra>
